<compile_context>
chip_gen: v7x
topology: tpu7x:2x2x1
jax: 0.10.0
libtpu: 0.0.40
codegen_flags: <defaults>
</compile_context>

<pallas_src>
import math
import jax
import jax.numpy as jnp
from jax.experimental import pallas as pl
from jax.experimental.pallas import tpu as pltpu


def _round_up(x, m):
    return ((x + m - 1) // m) * m


def _make_emi_kernel(num_modalities, rank, out_pad):
    def kernel(*refs):
        # refs: [x_0, fw_0, row0_0, ..., x_{M-1}, fw_{M-1}, row0_{M-1}, bias, out]
        out_ref = refs[-1]
        bias_ref = refs[-2]
        fused = None
        for m in range(num_modalities):
            x = refs[3 * m][...]          # (TB, D_pad_m)      compute dtype
            fw = refs[3 * m + 1][...]     # (D_pad_m, R*O_pad) compute dtype
            row0 = refs[3 * m + 2][...]   # (1, R*O_pad)       f32
            # MXU matmul with f32 accumulation; the "ones" column of the
            # original formulation is the broadcast +row0 term
            # (fusion_weights already folded into modality 0's fw/row0).
            mf = jnp.dot(x, fw, preferred_element_type=jnp.float32) + row0
            fused = mf if fused is None else fused * mf          # f32 VPU product
        # Rank reduction: static, lane-aligned (out_pad % 128 == 0) slice sum.
        acc = fused[:, 0:out_pad]
        for r in range(1, rank):
            acc = acc + fused[:, r * out_pad:(r + 1) * out_pad]
        out_ref[...] = (acc + bias_ref[...]).astype(out_ref.dtype)
    return kernel


def emi_fusion_pallas(modalities, factors, fusion_weights, fusion_bias,
                      output_dim, rank, flatten=True,
                      compute_dtype=jnp.float32, block_b=128):
    """modalities: list of (B, *feat); factors: list of (rank, D_m+1, output_dim)."""
    batch = modalities[0].shape[0]
    num_mod = len(modalities)
    out_pad = _round_up(output_dim, 128)          # lane-dense output / fused cols
    ro = rank * out_pad

    # Batch tiling: only tile when it pays; a block equal to the full array
    # is legal for small B (second-to-last dim may equal the full dim).
    if batch > block_b:
        tb = block_b
        b_pad = _round_up(batch, tb)
    else:
        tb = batch
        b_pad = batch
    grid = (b_pad // tb,)

    kernel_inputs = []
    in_specs = []
    d_pads = []

    for m, (x, fac) in enumerate(zip(modalities, factors)):
        x2 = x.reshape(batch, -1) if flatten else x
        d = x2.shape[1]
        d_pad = _round_up(d, 8)
        d_pads.append(d_pad)

        # Zero-pad batch / feature dims (exact: zero x columns hit zero factor
        # rows; padded batch rows are sliced off after the call).
        x2 = jnp.pad(x2, ((0, b_pad - batch), (0, d_pad - d)))
        x2 = x2.astype(compute_dtype)

        fac = fac.astype(jnp.float32)
        if m == 0:
            # Fold fusion_weights into factor 0 (replaces the selector matmul).
            fac = fusion_weights.reshape(rank, 1, 1).astype(jnp.float32) * fac

        row0 = fac[:, 0, :]                                   # (R, O)  "ones" row
        w = fac[:, 1:, :]                                     # (R, D, O)
        row0 = jnp.pad(row0, ((0, 0), (0, out_pad - output_dim)))
        w = jnp.pad(w, ((0, 0), (0, d_pad - d), (0, out_pad - output_dim)))
        # (R, D_pad, O_pad) -> (D_pad, R, O_pad) -> (D_pad, R*O_pad); columns
        # are (r * O_pad + o), consistent across modalities and with the
        # in-kernel rank slices.
        w2 = jnp.transpose(w, (1, 0, 2)).reshape(d_pad, ro).astype(compute_dtype)
        row0 = row0.reshape(1, ro)                            # stays f32

        kernel_inputs.append(x2)
        in_specs.append(pl.BlockSpec((tb, d_pad), lambda i: (i, 0)))
        kernel_inputs.append(w2)
        in_specs.append(pl.BlockSpec((d_pad, ro), lambda i: (0, 0)))
        kernel_inputs.append(row0)
        in_specs.append(pl.BlockSpec((1, ro), lambda i: (0, 0)))

    bias = jnp.pad(fusion_bias.reshape(1, output_dim).astype(jnp.float32),
                   ((0, 0), (0, out_pad - output_dim)))
    kernel_inputs.append(bias)
    in_specs.append(pl.BlockSpec((1, out_pad), lambda i: (0, 0)))

    # VMEM budget estimate (sized so the same config is safe on v7x's 64 MiB).
    itemsize = jnp.dtype(compute_dtype).itemsize
    vmem_bytes = 0
    for d_pad in d_pads:
        vmem_bytes += 2 * tb * d_pad * itemsize     # double-buffered x tiles
        vmem_bytes += 2 * d_pad * ro * itemsize     # factor weights
        vmem_bytes += 2 * ro * 4                    # row0
    vmem_bytes += 2 * out_pad * 4                   # bias
    vmem_bytes += 2 * tb * out_pad * 4              # out tiles
    vmem_bytes += (num_mod + 2) * tb * ro * 4       # live f32 intermediates
    vmem_limit = min(max(int(vmem_bytes * 1.5) + (1 << 20), 32 << 20), 64 << 20)

    out = pl.pallas_call(
        _make_emi_kernel(num_mod, rank, out_pad),
        out_shape=jax.ShapeDtypeStruct((b_pad, out_pad), jnp.float32),
        grid=grid,
        in_specs=in_specs,
        out_specs=pl.BlockSpec((tb, out_pad), lambda i: (i, 0)),
        compiler_params=pltpu.CompilerParams(
            dimension_semantics=("parallel",),
            vmem_limit_bytes=vmem_limit),
    )(*kernel_inputs)
    return out[:batch, :output_dim]


def emi_fusion_reference(modalities, factors, fusion_weights, fusion_bias,
                         output_dim, flatten=True):
    """Pure-JAX reference mirroring the PyTorch forward exactly."""
    batch = modalities[0].shape[0]
    ones = jnp.ones((batch, 1), dtype=modalities[0].dtype)
    fused = None
    for x, fac in zip(modalities, factors):
        x2 = x.reshape(batch, -1) if flatten else x
        xw = jnp.concatenate([ones, x2], axis=1)                 # (B, D+1)
        mf = jnp.einsum('bd,rdo->rbo', xw, fac)                  # (R, B, O)
        fused = mf if fused is None else fused * mf
    out = jnp.einsum('xr,bro->bxo', fusion_weights,
                     jnp.transpose(fused, (1, 0, 2)))[:, 0, :]   # (B, O)
    out = out + fusion_bias
    return out.reshape(-1, output_dim)


def _xavier_normal(key, shape):
    # PyTorch xavier_normal_ on a 3-D tensor (R, D+1, O):
    # fan_in = size(1) * prod(sizes[2:]), fan_out = size(0) * prod(sizes[2:])
    recep = 1
    for s in shape[2:]:
        recep *= s
    fan_in = shape[1] * recep
    fan_out = shape[0] * recep
    std = math.sqrt(2.0 / (fan_in + fan_out))
    return std * jax.random.normal(key, shape, dtype=jnp.float32)


if __name__ == "__main__":
    key = jax.random.PRNGKey(0)
    k1, k2, k3, k4, k5 = jax.random.split(key, 5)

    batch = 2
    rank = 4
    output_dim = 32
    # two modalities: one already 2-D, one multi-dim (exercises flatten=True)
    x_a = jax.random.normal(k1, (batch, 8), dtype=jnp.float32)        # D_a = 8
    x_b = jax.random.normal(k2, (batch, 4, 4), dtype=jnp.float32)     # D_b = 16
    modalities = [x_a, x_b]
    input_dims = [8, 16]

    factors = [
        _xavier_normal(k3, (rank, input_dims[0] + 1, output_dim)),
        _xavier_normal(k4, (rank, input_dims[1] + 1, output_dim)),
    ]
    # fusion_weights (1, rank): xavier on 2-D -> std = sqrt(2/(rank+1))
    fusion_weights = math.sqrt(2.0 / (rank + 1)) * jax.random.normal(
        k5, (1, rank), dtype=jnp.float32)
    fusion_bias = jnp.zeros((1, output_dim), dtype=jnp.float32)

    ref = emi_fusion_reference(modalities, factors, fusion_weights, fusion_bias,
                               output_dim, flatten=True)

    # f32 path: exact up to rounding order of the folded fusion weights and
    # MXU f32 accumulation order.
    out_f32 = emi_fusion_pallas(modalities, factors, fusion_weights, fusion_bias,
                                output_dim, rank, flatten=True,
                                compute_dtype=jnp.float32)
    out_f32 = jax.block_until_ready(out_f32)
    assert out_f32.shape == (batch, output_dim)
    assert jnp.allclose(out_f32, ref, atol=1e-3, rtol=1e-3), "f32 mismatch vs reference"

    # bf16-matmul / f32-accumulate path (the v6e/v7x production config).
    out_bf16 = emi_fusion_pallas(modalities, factors, fusion_weights, fusion_bias,
                                 output_dim, rank, flatten=True,
                                 compute_dtype=jnp.bfloat16)
    out_bf16 = jax.block_until_ready(out_bf16)
    assert out_bf16.shape == (batch, output_dim)
    assert jnp.allclose(out_bf16, ref, atol=5e-2, rtol=5e-2), "bf16 mismatch vs reference"

    print("KERNEL_OK")
</pallas_src>

<mosaic_0001>
module attributes {stable_mosaic.version = 11 : i64} {
  func.func @kernel(%arg0: i32, %arg1: memref<2x8xf32, #tpu.memory_space<vmem>>, %arg2: memref<8x512xf32, #tpu.memory_space<vmem>>, %arg3: memref<1x512xf32, #tpu.memory_space<vmem>>, %arg4: memref<2x16xf32, #tpu.memory_space<vmem>>, %arg5: memref<16x512xf32, #tpu.memory_space<vmem>>, %arg6: memref<1x512xf32, #tpu.memory_space<vmem>>, %arg7: memref<1x128xf32, #tpu.memory_space<vmem>>, %arg8: memref<2x128xf32, #tpu.memory_space<vmem>>) attributes {dimension_semantics = [#tpu.dimension_semantics<parallel>], iteration_bounds = array<i64: 1>, scalar_prefetch = 0 : i64, scratch_operands = 0 : i64, tpu.core_type = #tpu.core_type<tc>, window_params = [{transform_indices = @transform_0, window_bounds = array<i64: 2, 8>}, {pipeline_mode = #tpu.pipeline_mode<synchronous>, transform_indices = @transform_1, window_bounds = array<i64: 8, 512>}, {pipeline_mode = #tpu.pipeline_mode<synchronous>, transform_indices = @transform_2, window_bounds = array<i64: 1, 512>}, {transform_indices = @transform_3, window_bounds = array<i64: 2, 16>}, {pipeline_mode = #tpu.pipeline_mode<synchronous>, transform_indices = @transform_4, window_bounds = array<i64: 16, 512>}, {pipeline_mode = #tpu.pipeline_mode<synchronous>, transform_indices = @transform_5, window_bounds = array<i64: 1, 512>}, {pipeline_mode = #tpu.pipeline_mode<synchronous>, transform_indices = @transform_6, window_bounds = array<i64: 1, 128>}, {transform_indices = @transform_7, window_bounds = array<i64: 2, 128>}]} {
    %c0 = arith.constant 0 : index
    %c0_0 = arith.constant 0 : index
    %0 = vector.load %arg1[%c0, %c0_0] : memref<2x8xf32, #tpu.memory_space<vmem>>, vector<2x8xf32>
    %c0_1 = arith.constant 0 : index
    %c0_2 = arith.constant 0 : index
    %1 = vector.load %arg2[%c0_1, %c0_2] : memref<8x512xf32, #tpu.memory_space<vmem>>, vector<8x512xf32>
    %c0_3 = arith.constant 0 : index
    %c0_4 = arith.constant 0 : index
    %2 = vector.load %arg3[%c0_3, %c0_4] : memref<1x512xf32, #tpu.memory_space<vmem>>, vector<1x512xf32>
    %cst = arith.constant dense<0.000000e+00> : vector<2x512xf32>
    %3 = tpu.matmul %0, %1, %cst {dimension_numbers = #tpu.dot_dimension_numbers<[1], [0], [0], [1], [0, 0, 1, 1], [], []>} : vector<2x8xf32>, vector<8x512xf32>, vector<2x512xf32> -> vector<2x512xf32>
    %4 = vector.broadcast %2 : vector<1x512xf32> to vector<2x512xf32>
    %5 = arith.addf %3, %4 : vector<2x512xf32>
    %c0_5 = arith.constant 0 : index
    %c0_6 = arith.constant 0 : index
    %6 = vector.load %arg4[%c0_5, %c0_6] : memref<2x16xf32, #tpu.memory_space<vmem>>, vector<2x16xf32>
    %c0_7 = arith.constant 0 : index
    %c0_8 = arith.constant 0 : index
    %7 = vector.load %arg5[%c0_7, %c0_8] : memref<16x512xf32, #tpu.memory_space<vmem>>, vector<16x512xf32>
    %c0_9 = arith.constant 0 : index
    %c0_10 = arith.constant 0 : index
    %8 = vector.load %arg6[%c0_9, %c0_10] : memref<1x512xf32, #tpu.memory_space<vmem>>, vector<1x512xf32>
    %cst_11 = arith.constant dense<0.000000e+00> : vector<2x512xf32>
    %9 = tpu.matmul %6, %7, %cst_11 {dimension_numbers = #tpu.dot_dimension_numbers<[1], [0], [0], [1], [0, 0, 1, 1], [], []>} : vector<2x16xf32>, vector<16x512xf32>, vector<2x512xf32> -> vector<2x512xf32>
    %10 = vector.broadcast %8 : vector<1x512xf32> to vector<2x512xf32>
    %11 = arith.addf %9, %10 : vector<2x512xf32>
    %12 = arith.mulf %5, %11 : vector<2x512xf32>
    %13 = vector.extract_strided_slice %12 {offsets = [0, 0], sizes = [2, 128], strides = [1, 1]} : vector<2x512xf32> to vector<2x128xf32>
    %14 = vector.extract_strided_slice %12 {offsets = [0, 128], sizes = [2, 128], strides = [1, 1]} : vector<2x512xf32> to vector<2x128xf32>
    %15 = arith.addf %13, %14 : vector<2x128xf32>
    %16 = vector.extract_strided_slice %12 {offsets = [0, 256], sizes = [2, 128], strides = [1, 1]} : vector<2x512xf32> to vector<2x128xf32>
    %17 = arith.addf %15, %16 : vector<2x128xf32>
    %18 = vector.extract_strided_slice %12 {offsets = [0, 384], sizes = [2, 128], strides = [1, 1]} : vector<2x512xf32> to vector<2x128xf32>
    %19 = arith.addf %17, %18 : vector<2x128xf32>
    %c0_12 = arith.constant 0 : index
    %c0_13 = arith.constant 0 : index
    %20 = vector.load %arg7[%c0_12, %c0_13] : memref<1x128xf32, #tpu.memory_space<vmem>>, vector<1x128xf32>
    %21 = vector.broadcast %20 : vector<1x128xf32> to vector<2x128xf32>
    %22 = arith.addf %19, %21 : vector<2x128xf32>
    %c0_14 = arith.constant 0 : index
    %c0_15 = arith.constant 0 : index
    %23 = vector.load %arg8[%c0_14, %c0_15] : memref<2x128xf32, #tpu.memory_space<vmem>>, vector<2x128xf32>
    tpu.vector_store %arg8[%c0_14, %c0_15], %22 {strides = array<i32>} : memref<2x128xf32, #tpu.memory_space<vmem>>, vector<2x128xf32>,
    return
  }
  func.func @transform_0(%arg0: i32) -> (i32, i32) {
    %c0_i32 = arith.constant 0 : i32
    %c0_i32_0 = arith.constant 0 : i32
    return %arg0, %c0_i32 : i32, i32
  }
  func.func @transform_1(%arg0: i32) -> (i32, i32) {
    %c0_i32 = arith.constant 0 : i32
    %c0_i32_0 = arith.constant 0 : i32
    %c0_i32_1 = arith.constant 0 : i32
    return %c0_i32, %c0_i32_0 : i32, i32
  }
  func.func @transform_2(%arg0: i32) -> (i32, i32) {
    %c0_i32 = arith.constant 0 : i32
    %c0_i32_0 = arith.constant 0 : i32
    %c0_i32_1 = arith.constant 0 : i32
    return %c0_i32, %c0_i32_0 : i32, i32
  }
  func.func @transform_3(%arg0: i32) -> (i32, i32) {
    %c0_i32 = arith.constant 0 : i32
    %c0_i32_0 = arith.constant 0 : i32
    return %arg0, %c0_i32 : i32, i32
  }
  func.func @transform_4(%arg0: i32) -> (i32, i32) {
    %c0_i32 = arith.constant 0 : i32
    %c0_i32_0 = arith.constant 0 : i32
    %c0_i32_1 = arith.constant 0 : i32
    return %c0_i32, %c0_i32_0 : i32, i32
  }
  func.func @transform_5(%arg0: i32) -> (i32, i32) {
    %c0_i32 = arith.constant 0 : i32
    %c0_i32_0 = arith.constant 0 : i32
    %c0_i32_1 = arith.constant 0 : i32
    return %c0_i32, %c0_i32_0 : i32, i32
  }
  func.func @transform_6(%arg0: i32) -> (i32, i32) {
    %c0_i32 = arith.constant 0 : i32
    %c0_i32_0 = arith.constant 0 : i32
    %c0_i32_1 = arith.constant 0 : i32
    return %c0_i32, %c0_i32_0 : i32, i32
  }
  func.func @transform_7(%arg0: i32) -> (i32, i32) {
    %c0_i32 = arith.constant 0 : i32
    %c0_i32_0 = arith.constant 0 : i32
    return %arg0, %c0_i32 : i32, i32
  }
}

</mosaic_0001>

<bundles_post_ra>
// kernel: tpu_custom_call.1
= control target key start
LH: loop header
LB: loop body
LE: loop exit
PB: predicated region body
PF: predicated region fallthrough
CT: control target
= control target key end

     0   :  { %12 = vsyncpa [#allocation3], 0  ;;  %s667_s0 = inlined_call_operand.hbm [shape: f32[2,8], index: 0, kind: input, shape index: {}]   ;;  %s668_s1 = inlined_call_operand.hbm [shape: f32[8,512], index: 1, kind: input, shape index: {}]   ;;  %s669_s2 = inlined_call_operand.vmem [shape: f32[1,512], index: 2, kind: input, shape index: {}]   ;;  %s670_s3 = inlined_call_operand.vmem [shape: f32[2,16], index: 3, kind: input, shape index: {}]   ;;  %s671_s4 = inlined_call_operand.hbm [shape: f32[16,512], index: 4, kind: input, shape index: {}]   ;;  %s672_s5 = inlined_call_operand.vmem [shape: f32[1,512], index: 5, kind: input, shape index: {}]   ;;  %s673_s6 = inlined_call_operand.vmem [shape: f32[1,128], index: 6, kind: input, shape index: {}]   ;;  %s674_s7 = inlined_call_operand.hbm [shape: f32[2,128], index: 7, kind: output, shape index: {}]  }
   0x1   :  { %13 = vsyncpa [#allocation6], 0 }
   0x2   :  { %14 = vsyncpa [#allocation4], 0  ;;  %s560_s24 = smov [#allocation5]   ;;  %s561_s26 = smov [#allocation2]  }
   0x3   :  { %s31_s25 = sshll.u32 %s560_s24, 4  ;;  %s21_s27 = sshll.u32 %s561_s26, 4  ;;  %s32_s25 = int_to_ptr.vmem [resolvable:$true] %s31_s25  ;;  %s22_s27 = int_to_ptr.vmem [resolvable:$true] %s21_s27 }
   0x4   :  { %s466_s30 = scalar_lea.hbm %s668_s1, 512 }
   0x5   :  { %p467_p0 = scmp.ne.s32.totalorder %s668_s1, %s466_s30  ;;  %p470_p1 = scmp.lt.u32.totalorder %s466_s30, %s668_s1 }
   0x7   :  { %p472_p2 = pnand %p470_p1, %p467_p0 }
   0x9   :  { %475 = shalt.err (!%p472_p2)
}
   0xa   :  { %s476_s12 = scalar_lea.vmem %s32_s25, 512  ;;  %p481_p4 = scmp.lt.s32.totalorder %s32_s25, %s32_s25 }
   0xb   :  { %p477_p3 = scmp.ne.s32.totalorder %s32_s25, %s476_s12  ;;  %p482_p5 = scmp.lt.s32.totalorder %s476_s12, %s476_s12 }
   0xd   :  { %p483_p6 = por %p482_p5, %p481_p4 }
   0xf   :  { %p484_p7 = pnand %p483_p6, %p477_p3 }
  0x11   :  { %487 = shalt.err (!%p484_p7)
}
  0x12   :  { %34 = dma.hbm_to_vmem [thread:$0]  %s668_s1, 512, %s32_s25, [#allocation6]  }
  0x13   :  { %s488_s17 = scalar_lea.hbm %s667_s0, 32 }
  0x14   :  { %p489_p8 = scmp.ne.s32.totalorder %s667_s0, %s488_s17  ;;  %p492_p9 = scmp.lt.u32.totalorder %s488_s17, %s667_s0 }
  0x16   :  { %p494_p10 = pnand %p492_p9, %p489_p8 }
  0x18   :  { %497 = shalt.err (!%p494_p10)
}
  0x19   :  { %s498_s22 = scalar_lea.vmem %s22_s27, 32  ;;  %p503_p12 = scmp.lt.s32.totalorder %s22_s27, %s22_s27 }
  0x1a   :  { %p499_p11 = scmp.ne.s32.totalorder %s22_s27, %s498_s22  ;;  %p504_p13 = scmp.lt.s32.totalorder %s498_s22, %s498_s22 }
  0x1c   :  { %p505_p0 = por %p504_p13, %p503_p12 }
  0x1e   :  { %p506_p1 = pnand %p505_p0, %p499_p11 }
  0x20   :  { %509 = shalt.err (!%p506_p1)
}
  0x21   :  { %24 = dma.hbm_to_vmem [thread:$0]  %s667_s0, 32, %s22_s27, [#allocation3]  }
  0x22   :  { %s562_s24 = smov [#allocation7]   ;;  %s510_s29 = scalar_lea.hbm %s671_s4, 1024 }
  0x23   :  { %s44_s25 = sshll.u32 %s562_s24, 4  ;;  %p511_p2 = scmp.ne.s32.totalorder %s671_s4, %s510_s29  ;;  %s45_s25 = int_to_ptr.vmem [resolvable:$true] %s44_s25 }
  0x24   :  { %p514_p3 = scmp.lt.u32.totalorder %s510_s29, %s671_s4 }
  0x26   :  { %p516_p4 = pnand %p514_p3, %p511_p2 }
  0x28   :  { %519 = shalt.err (!%p516_p4)
}
  0x29   :  { %s520_s11 = scalar_lea.vmem %s45_s25, 1024  ;;  %p525_p6 = scmp.lt.s32.totalorder %s45_s25, %s45_s25 }
  0x2a   :  { %p521_p5 = scmp.ne.s32.totalorder %s45_s25, %s520_s11  ;;  %p526_p7 = scmp.lt.s32.totalorder %s520_s11, %s520_s11 }
  0x2c   :  { %p527_p8 = por %p526_p7, %p525_p6 }
  0x2e   :  { %p528_p9 = pnand %p527_p8, %p521_p5 }
  0x30   :  { %531 = shalt.err (!%p528_p9)
}
  0x31   :  { %s563_s0 = smov 512   ;;  %s564_s27 = smov 32  }
  0x32   :  { %50 = dma.hbm_to_vmem [thread:$0]  %s671_s4, 1024, %s45_s25, [#allocation6], %s563_s0, %s563_s0, %s564_s27  }
  0x33   :  { %554 = dma.done.wait [#allocation3], 32  }
  0x34   :  { %555 = vsyncadd [#allocation3], 4294967264 }
  0x35   :  { %556 = dma.done.wait [#allocation6], 1536  }
  0x36   :  { %557 = vsyncadd [#allocation6], 4294965760  ;;  %v565_v0 = vmov 0.0   ;;  %v66_v1 = vld [vmem:[#allocation5 + $0x8] sm:$0xff]  ;;  %v68_v2 = vld [vmem:[#allocation5 + $0x18] sm:$0xff]  ;;  %vm91_vm0 = vcmask 64512   ;;  %v71_v19 = vlaneseq }
  0x37   :  { %159 = vmatprep.mubr.f32.mxu0 %v565_v0  ;;  %230 = vmatprep.mubr.f32.mxu1 %v565_v0  ;;  %v65_v3 = vld [vmem:[#allocation5] sm:$0xff]  ;;  %v67_v4 = vld [vmem:[#allocation5 + $0x10] sm:$0xff]  ;;  %v64_v5 = vld [vmem:[#allocation2] sm:$0x3]  ;;  %vm268_vm1 = vcmask 130048  }
  0x38   :  { %95 = vmatprep.subr.mxu0 %v66_v1  ;;  %166 = vmatprep.subr.mxu1 %v68_v2  ;;  %v239_v6 = vld [vmem:[#allocation7 + $0x8] sm:$0xff]  ;;  %v241_v8 = vld [vmem:[#allocation7 + $0x18] sm:$0xff]  ;;  %v238_v12 = vld [vmem:[#allocation7] sm:$0xff]  ;;  %v72_v20 = vshrl.u32 %v71_v19, 7 }
  0x39   :  { %96 = vmatpush1.msra.mxu0 %v65_v3  ;;  %167 = vmatpush1.msra.mxu1 %v67_v4  ;;  %v243_v7 = vld [vmem:[#allocation7 + $0x28] sm:$0xff]  ;;  %v245_v9 = vld [vmem:[#allocation7 + $0x38] sm:$0xff]  ;;  %v242_v13 = vld [vmem:[#allocation7 + $0x20] sm:$0xff] }
  0x3a   :  { %446 = vmatmul.mubr.msk.f32.vlgmr.msra.gmra.mrb[0].mxu0 %vm91_vm0, %v64_v5  ;;  %447 = vmatmul.mubr.msk.f32.vlgmr.msra.gmra.mrb[0].mxu1 %vm91_vm0, %v64_v5  ;;  %v451_v10 = vpack.c.bf16 %v243_v7, %v239_v6  ;;  %v455_v11 = vpack.c.bf16 %v245_v9, %v241_v8  ;;  %v240_v14 = vld [vmem:[#allocation7 + $0x10] sm:$0xff]  ;;  %v453_v15 = vpack.c.bf16 %v242_v13, %v238_v12  ;;  %v237_v18 = vld [vmem:[%s670_s3] sm:$0x3]  ;;  %v81_v21 = vsub.s32 2, %v72_v20 }
  0x3b   :  { %v244_v16 = vld [vmem:[#allocation7 + $0x30] sm:$0xff]  ;;  %336 = vmatprep.mubr.f32.mxu0 %v565_v0  ;;  %407 = vmatprep.mubr.f32.mxu1 %v565_v0  ;;  %v73_v23 = vsub.s32 0, %v72_v20  ;;  %v77_v25 = vsub.s32 1, %v72_v20  ;;  %v85_v29 = vsub.s32 3, %v72_v20  ;;  %v450_v57 = vld [vmem:[%s673_s6] ss:$0 sm:$0xff] }
  0x3c   :  { %452 = vmatprep.subr.bf16.mxu0 %v451_v10  ;;  %456 = vmatprep.subr.bf16.mxu1 %v455_v11  ;;  %v457_v17 = vpack.c.bf16 %v244_v16, %v240_v14  ;;  %v69_v22 = vld [vmem:[%s669_s2] sm:$0xf] }
  0x3d   :  { %454 = vmatpush1.bf16.msra.mxu0 %v453_v15  ;;  %v246_v27 = vld [vmem:[%s672_s5] sm:$0xf]  ;;  %v82_v31 = vrot.slane %v69_v22, %v81_v21  ;;  %v74_v32 = vrot.slane %v69_v22, %v73_v23  ;;  %v78_v34 = vrot.slane %v69_v22, %v77_v25  ;;  %v86_v37 = vrot.slane %v69_v22, %v85_v29  ;;  %s566_s5 = smov [#allocation8]  }
  0x3e   :  { %458 = vmatpush1.bf16.msra.mxu1 %v457_v17  ;;  %v251_v33 = vrot.slane %v246_v27, %v73_v23  ;;  %v259_v35 = vrot.slane %v246_v27, %v81_v21  ;;  %v255_v36 = vrot.slane %v246_v27, %v77_v25  ;;  %v263_v38 = vrot.slane %v246_v27, %v85_v29  ;;  %s436_s19 = sshll.u32 %s566_s5, 4  ;;  %s437_s19 = int_to_ptr.vmem [resolvable:$true] %s436_s19 }
  0x3f   :  { %s532_s20 = scalar_lea.vmem %s437_s19, 32  ;;  %p537_p11 = scmp.lt.s32.totalorder %s437_s19, %s437_s19 }
  0x40   :  { %448 = vmatmul.mubr.msk.f32.vlgmr.msra.gmra.mrb[2].mxu0 %vm268_vm1, %v237_v18  ;;  %p533_p10 = scmp.ne.s32.totalorder %s437_s19, %s532_s20  ;;  %p538_p12 = scmp.lt.s32.totalorder %s532_s20, %s532_s20 }
  0x41   :  { %449 = vmatmul.mubr.msk.f32.vlgmr.msra.gmra.mrb[2].mxu1 %vm268_vm1, %v237_v18 }
  0x42   :  { %p539_p13 = por %p538_p12, %p537_p11 }
  0x44   :  { %p540_p0 = pnand %p539_p13, %p533_p10 }
 0x10d   :  { %v161_v24 = vpop.f32.mrb[0].mxu0  ;;  %v232_v26 = vpop.f32.mrb[0].mxu1 }
 0x10e   :  { %v163_v28 = vpop.f32.mrb[1].mxu0  ;;  %v234_v30 = vpop.f32.mrb[1].mxu1  ;;  %v233_v39 = vadd.f32 %v232_v26, %v82_v31  ;;  %v162_v41 = vadd.f32 %v161_v24, %v74_v32 }
 0x10f   :  { %v164_v45 = vadd.f32 %v163_v28, %v78_v34  ;;  %v235_v49 = vadd.f32 %v234_v30, %v86_v37 }
 0x113   :  { %v338_v40 = vpop.f32.mrb[2].mxu0 }
 0x114   :  { %v339_v42 = vadd.f32 %v338_v40, %v251_v33  ;;  %v409_v43 = vpop.f32.mrb[2].mxu1  ;;  %v340_v44 = vpop.f32.mrb[3].mxu0 }
 0x115   :  { %v410_v46 = vadd.f32 %v409_v43, %v259_v35  ;;  %v341_v47 = vadd.f32 %v340_v44, %v255_v36  ;;  %v411_v48 = vpop.f32.mrb[3].mxu1 }
 0x116   :  { %v414_v50 = vmul.f32 %v339_v42, %v162_v41  ;;  %v412_v51 = vadd.f32 %v411_v48, %v263_v38 }
 0x117   :  { %v416_v52 = vmul.f32 %v410_v46, %v233_v39  ;;  %v415_v53 = vmul.f32 %v341_v47, %v164_v45 }
 0x118   :  { %v417_v54 = vmul.f32 %v412_v51, %v235_v49 }
 0x119   :  { %v418_v55 = vadd.f32 %v415_v53, %v414_v50 }
 0x11b   :  { %v419_v56 = vadd.f32 %v418_v55, %v416_v52 }
 0x11d   :  { %v420_v58 = vadd.f32 %v419_v56, %v417_v54 }
 0x11f   :  { %v428_v59 = vadd.f32 %v450_v57, %v420_v58 }
 0x121   :  { %429 = vst [vmem:[#allocation8] sm:$0x3] %v428_v59 }
 0x122   :  { %543 = shalt.err (!%p540_p0)
}
 0x123   :  { %s544_s1 = scalar_lea.hbm %s674_s7, 32 }
 0x124   :  { %p545_p1 = scmp.ne.s32.totalorder %s674_s7, %s544_s1  ;;  %p548_p2 = scmp.lt.u32.totalorder %s544_s1, %s674_s7 }
 0x126   :  { %p550_p3 = pnand %p548_p2, %p545_p1 }
 0x128   :  { %553 = shalt.err (!%p550_p3)
}
 0x129   :  { %439 = dma.vmem_to_hbm [thread:$0]  %s437_s19, 32, %s674_s7, [#allocation4]  }
 0x12a   :  { %558 = dma.done.wait [#allocation4], 32  }
 0x12b   :  { %559 = vsyncadd [#allocation4], 4294967264 }
 0x12c   :  { %443 = vsyncpa [#allocation3], 1 }
 0x12d   :  { %444 = vsyncpa [#allocation6], 1 }
 0x12e   :  { %445 = vsyncpa [#allocation4], 1 }

</bundles_post_ra>
